<compile_context>
chip_gen: v5e
topology: v5e:2x2
jax: 0.10.0
libtpu: 0.0.40
codegen_flags: <defaults>
</compile_context>

<pallas_src>
import jax
import jax.numpy as jnp
from jax.experimental import pallas as pl
from jax.experimental.pallas import tpu as pltpu

_LANES = 128      # lane width (last-dim alignment)
_SUBLANES = 8     # sublane width (second-to-last-dim alignment)

# w1 larger than this (single-buffered) -> stream it over K instead of keeping
# it VMEM-resident (keeps the fused path comfortably inside v7x's 64 MiB VMEM).
_W1_RESIDENT_BYTES_MAX = 24 << 20


def _round_up(x: int, m: int) -> int:
    return ((x + m - 1) // m) * m


def _cdiv(a: int, b: int) -> int:
    return (a + b - 1) // b


def _maybe_pad2d(a, rows: int, cols: int):
    pr, pc = rows - a.shape[0], cols - a.shape[1]
    if pr == 0 and pc == 0:
        return a                      # no-op pad skipped (no extra HBM traffic)
    return jnp.pad(a, ((0, pr), (0, pc)))


# --------------------- fused kernel: weights VMEM-resident -------------------
def _fused_kernel(x_ref, w1_ref, b1_ref, w2_ref, b2_ref, o_ref):
    # fc1: [tb, in_pad] @ [in_pad, in_pad], f32 accumulate on the MXU.
    h = jnp.dot(x_ref[...], w1_ref[...], preferred_element_type=jnp.float32)
    # Bias + ReLU in f32.
    h = jnp.maximum(h + b1_ref[...], 0.0)
    # fc2: cast only the matmul operand to the weight dtype (no-op for f32).
    y = jnp.dot(h.astype(w2_ref.dtype), w2_ref[...],
                preferred_element_type=jnp.float32)
    o_ref[...] = (y + b2_ref[...]).astype(o_ref.dtype)


# ------------- K-tiled kernel: fc1 weight streamed over the K axis -----------
def _ktiled_kernel(x_ref, w1_ref, b1_ref, w2_ref, b2_ref, o_ref, h_ref):
    k = pl.program_id(1)

    @pl.when(k == 0)
    def _():
        h_ref[...] = jnp.zeros_like(h_ref)

    # Partial fc1 contraction for this K tile, accumulated in f32 VMEM scratch.
    h_ref[...] += jnp.dot(x_ref[...], w1_ref[...],
                          preferred_element_type=jnp.float32)

    @pl.when(k == pl.num_programs(1) - 1)
    def _():
        h = jnp.maximum(h_ref[...] + b1_ref[...], 0.0)
        y = jnp.dot(h.astype(w2_ref.dtype), w2_ref[...],
                    preferred_element_type=jnp.float32)
        o_ref[...] = (y + b2_ref[...]).astype(o_ref.dtype)


def projector_simclr(x, w1, b1, w2, b2, *, tb=None, tk=None, k_tiled=None):
    """x: [B, in_dim]; w1: [in_dim, in_dim]; b1: [1, in_dim];
       w2: [in_dim, out_dim]; b2: [1, out_dim]  ->  [B, out_dim]"""
    B, in_dim = x.shape
    out_dim = w2.shape[1]

    # Lane-pad feature dims so output stores are lane-dense and MXU tiles full.
    in_pad = _round_up(in_dim, _LANES)
    out_pad = _round_up(out_dim, _LANES)
    # Batch is padded only to a sublane multiple; the grid handles a ragged
    # last block (masked stores), so no tb-sized over-padding of B.
    b_pad = _round_up(B, _SUBLANES)

    x_it = x.dtype.itemsize
    w_it = w1.dtype.itemsize

    # Decide fused (w1 resident) vs K-tiled (w1 streamed) path.
    if k_tiled is None:
        k_tiled = in_pad * in_pad * w_it > _W1_RESIDENT_BYTES_MAX

    # ---- batch tile ----------------------------------------------------------
    if tb is None:
        tb = min(512, b_pad)
        if in_pad >= 2048:
            tb = min(tb, 256)                       # 64 MiB-VMEM (v7x) budget
        if B >= 2 * _SUBLANES:
            # >= 2 grid steps so the "parallel" axis can shard across 2 TCs.
            tb = min(tb, _round_up(_cdiv(B, 2), _SUBLANES))
    tb = max(_SUBLANES, min(_round_up(tb, _SUBLANES), b_pad))

    # ---- K tile (only for the streamed path); must divide in_pad exactly ----
    if tk is None:
        tk = 512
    tk = max(_LANES, min((tk // _LANES) * _LANES, in_pad))
    while in_pad % tk != 0:
        tk -= _LANES

    # ---- pad operands (skipped entirely when already aligned) ---------------
    xp = _maybe_pad2d(x, b_pad, in_pad)
    w1p = _maybe_pad2d(w1, in_pad, in_pad)
    b1p = _maybe_pad2d(b1, 1, in_pad)
    w2p = _maybe_pad2d(w2, in_pad, out_pad)
    b2p = _maybe_pad2d(b2, 1, out_pad)

    grid_b = _cdiv(b_pad, tb)

    if not k_tiled:
        grid = (grid_b,)
        in_specs = [
            # x tile marches along the batch axis (double-buffered pipeline).
            pl.BlockSpec((tb, in_pad), lambda i: (i, 0)),
            # Grid-invariant params: fetched once -> single-buffered.
            pl.BlockSpec((in_pad, in_pad), lambda i: (0, 0),
                         pipeline_mode=pl.Buffered(1)),
            pl.BlockSpec((1, in_pad), lambda i: (0, 0),
                         pipeline_mode=pl.Buffered(1)),
            pl.BlockSpec((in_pad, out_pad), lambda i: (0, 0),
                         pipeline_mode=pl.Buffered(1)),
            pl.BlockSpec((1, out_pad), lambda i: (0, 0),
                         pipeline_mode=pl.Buffered(1)),
        ]
        out_specs = pl.BlockSpec((tb, out_pad), lambda i: (i, 0))
        scratch_shapes = []
        semantics = ("parallel",)
        kernel = _fused_kernel
        vmem_est = (
            (in_pad * in_pad + in_pad + in_pad * out_pad + out_pad) * w_it
            + 2 * tb * in_pad * x_it          # double-buffered x tiles
            + 2 * tb * out_pad * x_it         # double-buffered out tiles
            + tb * (in_pad + out_pad) * 4     # f32 intermediates
        )
    else:
        grid = (grid_b, in_pad // tk)
        in_specs = [
            pl.BlockSpec((tb, tk), lambda i, k: (i, k)),
            # fc1 weight streamed over K (default double-buffering hides DMA).
            pl.BlockSpec((tk, in_pad), lambda i, k: (k, 0)),
            pl.BlockSpec((1, in_pad), lambda i, k: (0, 0),
                         pipeline_mode=pl.Buffered(1)),
            pl.BlockSpec((in_pad, out_pad), lambda i, k: (0, 0),
                         pipeline_mode=pl.Buffered(1)),
            pl.BlockSpec((1, out_pad), lambda i, k: (0, 0),
                         pipeline_mode=pl.Buffered(1)),
        ]
        out_specs = pl.BlockSpec((tb, out_pad), lambda i, k: (i, 0))
        scratch_shapes = [pltpu.VMEM((tb, in_pad), jnp.float32)]
        semantics = ("parallel", "arbitrary")
        kernel = _ktiled_kernel
        vmem_est = (
            2 * tk * in_pad * w_it                           # streamed w1 tiles
            + (in_pad + in_pad * out_pad + out_pad) * w_it   # resident b1/w2/b2
            + 2 * tb * tk * x_it
            + 2 * tb * out_pad * x_it
            + tb * in_pad * 4                                # h accumulator
            + tb * out_pad * 4
        )

    vmem_limit = min(56 << 20, max(8 << 20, int(vmem_est * 1.25) + (1 << 20)))

    cost = pl.CostEstimate(
        flops=2 * B * in_pad * (in_pad + out_pad),
        transcendentals=0,
        bytes_accessed=int(xp.size * x_it + (w1p.size + b1p.size + w2p.size
                                             + b2p.size) * w_it
                           + b_pad * out_pad * x_it),
    )

    out_padded = pl.pallas_call(
        kernel,
        out_shape=jax.ShapeDtypeStruct((b_pad, out_pad), x.dtype),
        grid_spec=pltpu.PrefetchScalarGridSpec(
            num_scalar_prefetch=0,
            grid=grid,
            in_specs=in_specs,
            out_specs=out_specs,
            scratch_shapes=scratch_shapes,
        ),
        compiler_params=pltpu.CompilerParams(
            dimension_semantics=semantics,
            vmem_limit_bytes=vmem_limit,
        ),
        cost_estimate=cost,
    )(xp, w1p, b1p, w2p, b2p)

    return out_padded[:B, :out_dim]


def reference(x, w1, b1, w2, b2):
    h = jnp.maximum(
        jnp.dot(x, w1, precision=jax.lax.Precision.HIGHEST) + b1, 0.0)
    return jnp.dot(h, w2, precision=jax.lax.Precision.HIGHEST) + b2


if __name__ == "__main__":
    key = jax.random.PRNGKey(0)

    def make_inputs(k, B, in_dim, out_dim):
        kx, kw1, kb1, kw2, kb2 = jax.random.split(k, 5)
        x = jax.random.normal(kx, (B, in_dim), dtype=jnp.float32)
        w1 = jax.random.normal(kw1, (in_dim, in_dim), dtype=jnp.float32) / jnp.sqrt(in_dim)
        b1 = jax.random.normal(kb1, (1, in_dim), dtype=jnp.float32) * 0.01
        w2 = jax.random.normal(kw2, (in_dim, out_dim), dtype=jnp.float32) / jnp.sqrt(in_dim)
        b2 = jax.random.normal(kb2, (1, out_dim), dtype=jnp.float32) * 0.01
        return x, w1, b1, w2, b2

    k1, k2 = jax.random.split(key)

    # Case 1: default fused path (weights VMEM-resident), batch auto-tiled into
    # 2 grid steps (tb=16, grid=(2,)).
    B, in_dim, out_dim = 32, 32, 16
    x, w1, b1, w2, b2 = make_inputs(k1, B, in_dim, out_dim)
    out = jax.block_until_ready(projector_simclr(x, w1, b1, w2, b2))
    ref = reference(x, w1, b1, w2, b2)
    assert out.shape == (B, out_dim)
    assert jnp.allclose(out, ref, atol=1e-3, rtol=1e-3), \
        float(jnp.max(jnp.abs(out - ref)))

    # Case 2: force the K-tiled (streamed fc1 weights) path with a ragged
    # batch (B=20 -> b_pad=24, tb=16 -> partial last block) and 2 K steps.
    B, in_dim, out_dim = 20, 256, 32
    x, w1, b1, w2, b2 = make_inputs(k2, B, in_dim, out_dim)
    out = jax.block_until_ready(
        projector_simclr(x, w1, b1, w2, b2, k_tiled=True, tk=128))
    ref = reference(x, w1, b1, w2, b2)
    assert out.shape == (B, out_dim)
    assert jnp.allclose(out, ref, atol=1e-3, rtol=1e-3), \
        float(jnp.max(jnp.abs(out - ref)))

    print("KERNEL_OK")
</pallas_src>

<mosaic_0001>
module attributes {stable_mosaic.version = 11 : i64} {
  func.func @_fused_kernel(%arg0: i32, %arg1: memref<16x128xf32, #tpu.memory_space<vmem>>, %arg2: memref<128x128xf32, #tpu.memory_space<vmem>>, %arg3: memref<1x128xf32, #tpu.memory_space<vmem>>, %arg4: memref<128x128xf32, #tpu.memory_space<vmem>>, %arg5: memref<1x128xf32, #tpu.memory_space<vmem>>, %arg6: memref<16x128xf32, #tpu.memory_space<vmem>>) attributes {dimension_semantics = [#tpu.dimension_semantics<parallel>], iteration_bounds = array<i64: 2>, scalar_prefetch = 0 : i64, scratch_operands = 0 : i64, tpu.core_type = #tpu.core_type<tc>, window_params = [{transform_indices = @transform_0, window_bounds = array<i64: 16, 128>}, {pipeline_mode = #tpu.pipeline_mode<synchronous>, transform_indices = @transform_1, window_bounds = array<i64: 128, 128>}, {pipeline_mode = #tpu.pipeline_mode<synchronous>, transform_indices = @transform_2, window_bounds = array<i64: 1, 128>}, {pipeline_mode = #tpu.pipeline_mode<synchronous>, transform_indices = @transform_3, window_bounds = array<i64: 128, 128>}, {pipeline_mode = #tpu.pipeline_mode<synchronous>, transform_indices = @transform_4, window_bounds = array<i64: 1, 128>}, {transform_indices = @transform_5, window_bounds = array<i64: 16, 128>}]} {
    %c0 = arith.constant 0 : index
    %c0_0 = arith.constant 0 : index
    %0 = vector.load %arg1[%c0, %c0_0] : memref<16x128xf32, #tpu.memory_space<vmem>>, vector<16x128xf32>
    %c0_1 = arith.constant 0 : index
    %c0_2 = arith.constant 0 : index
    %1 = vector.load %arg2[%c0_1, %c0_2] : memref<128x128xf32, #tpu.memory_space<vmem>>, vector<128x128xf32>
    %cst = arith.constant dense<0.000000e+00> : vector<16x128xf32>
    %2 = tpu.matmul %0, %1, %cst {dimension_numbers = #tpu.dot_dimension_numbers<[1], [0], [0], [1], [0, 0, 1, 1], [], []>} : vector<16x128xf32>, vector<128x128xf32>, vector<16x128xf32> -> vector<16x128xf32>
    %c0_3 = arith.constant 0 : index
    %c0_4 = arith.constant 0 : index
    %3 = vector.load %arg3[%c0_3, %c0_4] : memref<1x128xf32, #tpu.memory_space<vmem>>, vector<1x128xf32>
    %4 = vector.broadcast %3 : vector<1x128xf32> to vector<16x128xf32>
    %5 = arith.addf %2, %4 : vector<16x128xf32>
    %cst_5 = arith.constant 0.000000e+00 : f32
    %6 = vector.broadcast %cst_5 : f32 to vector<16x128xf32>
    %7 = arith.maximumf %5, %6 : vector<16x128xf32>
    %c0_6 = arith.constant 0 : index
    %c0_7 = arith.constant 0 : index
    %8 = vector.load %arg4[%c0_6, %c0_7] : memref<128x128xf32, #tpu.memory_space<vmem>>, vector<128x128xf32>
    %cst_8 = arith.constant dense<0.000000e+00> : vector<16x128xf32>
    %9 = tpu.matmul %7, %8, %cst_8 {dimension_numbers = #tpu.dot_dimension_numbers<[1], [0], [0], [1], [0, 0, 1, 1], [], []>} : vector<16x128xf32>, vector<128x128xf32>, vector<16x128xf32> -> vector<16x128xf32>
    %c0_9 = arith.constant 0 : index
    %c0_10 = arith.constant 0 : index
    %10 = vector.load %arg5[%c0_9, %c0_10] : memref<1x128xf32, #tpu.memory_space<vmem>>, vector<1x128xf32>
    %11 = vector.broadcast %10 : vector<1x128xf32> to vector<16x128xf32>
    %12 = arith.addf %9, %11 : vector<16x128xf32>
    %c0_11 = arith.constant 0 : index
    %c0_12 = arith.constant 0 : index
    %13 = vector.load %arg6[%c0_11, %c0_12] : memref<16x128xf32, #tpu.memory_space<vmem>>, vector<16x128xf32>
    tpu.vector_store %arg6[%c0_11, %c0_12], %12 {strides = array<i32>} : memref<16x128xf32, #tpu.memory_space<vmem>>, vector<16x128xf32>,
    return
  }
  func.func @transform_0(%arg0: i32) -> (i32, i32) {
    %c0_i32 = arith.constant 0 : i32
    %c0_i32_0 = arith.constant 0 : i32
    return %arg0, %c0_i32 : i32, i32
  }
  func.func @transform_1(%arg0: i32) -> (i32, i32) {
    %c0_i32 = arith.constant 0 : i32
    %c0_i32_0 = arith.constant 0 : i32
    %c0_i32_1 = arith.constant 0 : i32
    return %c0_i32, %c0_i32_0 : i32, i32
  }
  func.func @transform_2(%arg0: i32) -> (i32, i32) {
    %c0_i32 = arith.constant 0 : i32
    %c0_i32_0 = arith.constant 0 : i32
    %c0_i32_1 = arith.constant 0 : i32
    return %c0_i32, %c0_i32_0 : i32, i32
  }
  func.func @transform_3(%arg0: i32) -> (i32, i32) {
    %c0_i32 = arith.constant 0 : i32
    %c0_i32_0 = arith.constant 0 : i32
    %c0_i32_1 = arith.constant 0 : i32
    return %c0_i32, %c0_i32_0 : i32, i32
  }
  func.func @transform_4(%arg0: i32) -> (i32, i32) {
    %c0_i32 = arith.constant 0 : i32
    %c0_i32_0 = arith.constant 0 : i32
    %c0_i32_1 = arith.constant 0 : i32
    return %c0_i32, %c0_i32_0 : i32, i32
  }
  func.func @transform_5(%arg0: i32) -> (i32, i32) {
    %c0_i32 = arith.constant 0 : i32
    %c0_i32_0 = arith.constant 0 : i32
    return %arg0, %c0_i32 : i32, i32
  }
}

</mosaic_0001>

<bundles_post_ra>
// kernel: tpu_custom_call.1
= control target key start
LH: loop header
LB: loop body
LE: loop exit
PB: predicated region body
PF: predicated region fallthrough
CT: control target
= control target key end

     0   :  { %10 = vsyncpa [#allocation3], 0  ;;  %s967_s0 = inlined_call_operand.hbm [shape: f32[32,128], index: 0, kind: input, shape index: {}]   ;;  %s968_s1 = inlined_call_operand.hbm [shape: f32[128,128], index: 1, kind: input, shape index: {}]   ;;  %s969_s2 = inlined_call_operand.vmem [shape: f32[1,128], index: 2, kind: input, shape index: {}]   ;;  %s970_s3 = inlined_call_operand.hbm [shape: f32[128,128], index: 3, kind: input, shape index: {}]   ;;  %s971_s4 = inlined_call_operand.vmem [shape: f32[1,128], index: 4, kind: input, shape index: {}]   ;;  %s972_s5 = inlined_call_operand.hbm [shape: f32[32,128], index: 5, kind: output, shape index: {}]  }
   0x1   :  { %12 = vsyncpa [#allocation3 + $0x1], 0 }
   0x2   :  { %13 = vsyncpa [#allocation6], 0 }
   0x3   :  { %14 = vsyncpa [#allocation4], 0 }
   0x4   :  { %16 = vsyncpa [#allocation4 + $0x1], 0  ;;  %s803_s18 = smov 0   ;;  %s805_s19 = smov 0  }
   0x5   :  { %s807_s20 = smov 0   ;;  %s809_s21 = smov 0  }
   0x6 LB: > { %s824_s22 = sadd.s32 4294967295, %s765_s21   ;;  %s480_s23 = sadd.s32 4294967294, %s765_s21   ;;  %s765_s21 = sphi %s809_s21, %s984_s21   ;;  %s761_s20 = sphi %s807_s20, %s983_s20   ;;  %s757_s19 = sphi %s805_s19, %s982_s19   ;;  %s753_s18 = sphi %s803_s18, %s981_s18  }
   0x7   : > { %p42_p0 = scmp.ne.s32.totalorder %s757_s19, %s753_s18  ;;  %p43_p1 = scmp.eq.s32.totalorder %s824_s22, 0 }
   0x8   : > { %p150_p2 = scmp.eq.s32.totalorder %s824_s22, 1  ;;  %p156_p3 = scmp.eq.s32.totalorder %s480_s23, 1 }
   0x9   : > { %p833_p4 = por %p43_p1, %p42_p0  ;;  %p481_p5 = scmp.ge.s32.totalorder %s765_s21, 1 }
   0xa   : > { %p838_p6 = por %p156_p3, %p42_p0  ;;  %p163_p7 = scmp.lt.s32.totalorder %s765_s21, 3 }
   0xb   : > { %s174_s28 = sshll.u32 %s968_s1, 4  ;;  %s767_s30 = smov [#allocation5]   ;;  %s175_s28 = int_to_ptr.hbm [resolvable:$true] %s174_s28 }
   0xc   : > { %p846_p8 = pnand %p481_p5, %p163_p7  ;;  %s176_s6 = sshll.u32 %s767_s30, 4  ;;  %s177_s6 = int_to_ptr.vmem [resolvable:$true] %s176_s6 }
   0xd   : > { %s191_s9 = sshll.u32 %s970_s3, 4  ;;  %s973_s10 = smov 128   ;;  %s192_s9 = int_to_ptr.hbm [resolvable:$true] %s191_s9 }
   0xe   : > { %p544_p9 = pneg %p846_p8  ;;  %s769_s11 = smov 8  }
   0xf   : > { %s770_s12 = smov [#allocation7]   ;;  %s865_s14 = sadd.s32 1, %s765_s21  }
  0x10   : > { %p545_p10 = pnand %p544_p9, %p43_p1  ;;  %s193_s13 = sshll.u32 %s770_s12, 4  ;;  %s194_s13 = int_to_ptr.vmem [resolvable:$true] %s193_s13 }
  0x11   : > { %s29_s15 = sadd.s32 1, %s761_s20  ;;  %s26_s16 = ssub.s32 %s765_s21, %s865_s14 }
  0x12   : > { %547 = dma.hbm_to_vmem [thread:$0]  (!%p545_p10), %s175_s28, 2048, %s177_s6, [#allocation6], %s973_s10, %s973_s10, %s769_s11  }
  0x13   : > { %550 = dma.hbm_to_vmem [thread:$0]  (!%p545_p10), %s192_s9, 2048, %s194_s13, [#allocation6], %s973_s10, %s973_s10, %s769_s11  }
  0x14   : > { %p36_p12 = scmp.ne.s32.totalorder %s761_s20, %s757_s19  ;;  %p27_p13 = scmp.eq.s32.totalorder %s26_s16, 0 }
  0x15   : > { %p37_p0 = scmp.eq.s32.totalorder %s765_s21, 0  ;;  %p561_p5 = scmp.lt.s32.totalorder %s765_s21, 2 }
  0x16   : > { %p875_p3 = por %p150_p2, %p36_p12  ;;  %s210_s26 = sand.u32 1, %s761_s20  }
  0x17   : > { %s881_s23 = scalar_select %p27_p13, %s761_s20, %s29_s15  }
  0x18   : > { %p38_p7 = por %p37_p0, %p36_p12  ;;  %s485_s27 = sshll.u32 %s210_s26, 4 }
  0x19   : > { %s498_s28 = sshll.u32 %s765_s21, 4  ;;  %s214_s8 = scalar_lea.vmem [#allocation2], %s485_s27 }
  0x1a   : > { %s219_s7 = scalar_lea.hbm %s967_s0, %s498_s28  ;;  %s222_s9 = sshll.u32 %s214_s8, 4  ;;  %s223_s9 = int_to_ptr.vmem [resolvable:$true] %s222_s9 }
  0x1b   : > { %s220_s12 = sshll.u32 %s219_s7, 4  ;;  %p888_p2 = pnand %p561_p5, %p38_p7  ;;  %s221_s12 = int_to_ptr.hbm [resolvable:$true] %s220_s12 }
  0x1c   : > { %s211_s15 = scalar_lea.sflag [#allocation3], %s210_s26  ;;  %s665_s16 = sshra.s32 %s221_s12, 4  ;;  %s666_s16 = int_to_ptr.hbm [resolvable:$true] %s665_s16 }
  0x1d   : > { %s667_s10 = scalar_lea.hbm %s666_s16, 16  ;;  %p669_p10 = pneg %p888_p2 }
  0x1e   : > { %p668_p9 = scmp.ne.s32.totalorder %s666_s16, %s667_s10  ;;  %s672_s30 = scalar_lea.hbm %s967_s0, 32 }
  0x1f   : > { %p673_p0 = scmp.lt.s32.totalorder %s666_s16, %s967_s0  ;;  %p674_p5 = scmp.lt.s32.totalorder %s672_s30, %s667_s10 }
  0x20   : > { %p670_p12 = pnand %p669_p10, %p668_p9 }
  0x21   : > { %p675_p7 = por %p674_p5, %p673_p0 }
  0x22   : > { %p671_p13 = pneg %p670_p12 }
  0x24   : > { %p676_p11 = pnand %p675_p7, %p671_p13 }
  0x26   : > { %679 = shalt.err (!%p676_p11)
}
  0x27   : > { %s979_s26 = smov 128   ;;  %234 = sbr.rel (%p846_p8) target bundleno = 353 (0x161), region = 40 }
  0x28   : > { %554 = dma.hbm_to_vmem [thread:$0]  (!%p888_p2), %s221_s12, 256, %s223_s9, %s211_s15, %s979_s26, %s979_s26, %s769_s11  }
  0x29   : > { %s908_s8 = sand.u32 (!%p846_p8), 1, %s757_s19  }
  0x2a   : > { %s489_s10 = sshll.u32 (!%p846_p8), %s908_s8, 4  ;;  %s237_s16 = scalar_lea.sflag (!%p846_p8), [#allocation3], %s908_s8 }
  0x2b   : > { %s914_s28 = scalar_lea.vmem (!%p846_p8), [#allocation2], %s489_s10 }
  0x2c   : > { %740 = dma.done.wait (%p833_p4), %s237_s16, 256  }
  0x2d   : > { %742 = vsyncadd (%p833_p4), %s237_s16, 4294967040 }
  0x2e   : > { %744 = dma.done.wait (%p43_p1), [#allocation6], 4096  }
  0x2f   : > { %746 = vsyncadd (%p43_p1), [#allocation6], 4294963200  ;;  %v297_v0 = vld [vmem:[#allocation5 + $0x78] sm:$0xff]  ;;  %v296_v1 = vld [vmem:[#allocation5 + $0x70] sm:$0xff]  ;;  %s277_s12 = scalar_lea.vmem [#allocation8], %s489_s10  ;;  %s499_s13 = sshll.u32 %s824_s22, 4 }
  0x30   : > { %500 = vmatpush.msra.mxu2 %v297_v0  ;;  %302 = vmatpush.msra.mxu0 %v297_v0  ;;  %v295_v2 = vld [vmem:[#allocation5 + $0x68] sm:$0xff]  ;;  %v294_v3 = vld [vmem:[#allocation5 + $0x60] sm:$0xff]  ;;  %v293_v4 = vld [vmem:[#allocation5 + $0x58] sm:$0xff]  ;;  %s384_s30 = scalar_lea.hbm %s972_s5, %s499_s13  ;;  %s385_s6 = sshll.u32 %s277_s12, 4  ;;  %s386_s6 = int_to_ptr.vmem [resolvable:$true] %s385_s6 }
  0x31   : > { %v342_v5 = vld [vmem:[#allocation7 + $0x78] sm:$0xff]  ;;  %v341_v6 = vld [vmem:[#allocation7 + $0x70] sm:$0xff]  ;;  %v340_v8 = vld [vmem:[#allocation7 + $0x68] sm:$0xff]  ;;  %s387_s7 = sshll.u32 %s384_s30, 4  ;;  %s373_s26 = scalar_lea.sflag [#allocation4], %s908_s8  ;;  %s388_s7 = int_to_ptr.hbm [resolvable:$true] %s387_s7 }
  0x32   : > { %501 = vmatpush.msra.mxu2 %v296_v1  ;;  %303 = vmatpush.msra.mxu0 %v296_v1  ;;  %v292_v7 = vld [vmem:[#allocation5 + $0x50] sm:$0xff]  ;;  %v291_v9 = vld [vmem:[#allocation5 + $0x48] sm:$0xff]  ;;  %v339_v10 = vld [vmem:[#allocation7 + $0x60] sm:$0xff]  ;;  %s709_s16 = sshra.s32 %s388_s7, 4  ;;  %s715_s24 = scalar_lea.hbm %s972_s5, 32  ;;  %s710_s16 = int_to_ptr.hbm [resolvable:$true] %s709_s16 }
  0x33   : > { %516 = vmatpush.msra.mxu3 %v342_v5  ;;  %347 = vmatpush.msra.mxu1 %v342_v5  ;;  %v290_v11 = vld [vmem:[#allocation5 + $0x40] sm:$0xff]  ;;  %v338_v12 = vld [vmem:[#allocation7 + $0x58] sm:$0xff]  ;;  %v337_v14 = vld [vmem:[#allocation7 + $0x50] sm:$0xff]  ;;  %p716_p11 = scmp.lt.s32.totalorder %s710_s16, %s972_s5 }
  0x34   : > { %502 = vmatpush.msra.mxu2 %v295_v2  ;;  %304 = vmatpush.msra.mxu0 %v295_v2  ;;  %v289_v13 = vld [vmem:[#allocation5 + $0x38] sm:$0xff]  ;;  %v288_v15 = vld [vmem:[#allocation5 + $0x30] sm:$0xff]  ;;  %v336_v16 = vld [vmem:[#allocation7 + $0x48] sm:$0xff] }
  0x35   : > { %517 = vmatpush.msra.mxu3 %v341_v6  ;;  %348 = vmatpush.msra.mxu1 %v341_v6  ;;  %v287_v17 = vld [vmem:[#allocation5 + $0x28] sm:$0xff]  ;;  %v335_v18 = vld [vmem:[#allocation7 + $0x40] sm:$0xff]  ;;  %v334_v20 = vld [vmem:[#allocation7 + $0x38] sm:$0xff] }
  0x36   : > { %503 = vmatpush.msra.mxu2 %v294_v3  ;;  %305 = vmatpush.msra.mxu0 %v294_v3  ;;  %v286_v19 = vld [vmem:[#allocation5 + $0x20] sm:$0xff]  ;;  %v285_v21 = vld [vmem:[#allocation5 + $0x18] sm:$0xff]  ;;  %v333_v22 = vld [vmem:[#allocation7 + $0x30] sm:$0xff] }
  0x37   : > { %518 = vmatpush.msra.mxu3 %v340_v8  ;;  %349 = vmatpush.msra.mxu1 %v340_v8  ;;  %v284_v23 = vld [vmem:[#allocation5 + $0x10] sm:$0xff]  ;;  %v332_v24 = vld [vmem:[#allocation7 + $0x28] sm:$0xff]  ;;  %v331_v26 = vld [vmem:[#allocation7 + $0x20] sm:$0xff] }
  0x38   : > { %504 = vmatpush.msra.mxu2 %v293_v4  ;;  %306 = vmatpush.msra.mxu0 %v293_v4  ;;  %v283_v25 = vld [vmem:[#allocation5 + $0x8] sm:$0xff]  ;;  %v282_v27 = vld [vmem:[#allocation5] sm:$0xff]  ;;  %v330_v30 = vld [vmem:[#allocation7 + $0x18] sm:$0xff] }
  0x39   : > { %519 = vmatpush.msra.mxu3 %v339_v10  ;;  %350 = vmatpush.msra.mxu1 %v339_v10  ;;  %v281_v28 = vld [vmem:[%s914_s28 + $0x8] sm:$0xff]  ;;  %v280_v29 = vld [vmem:[%s914_s28] sm:$0xff]  ;;  %s711_s28 = scalar_lea.hbm %s710_s16, 16 }
  0x3a   : > { %505 = vmatpush.msra.mxu2 %v292_v7  ;;  %307 = vmatpush.msra.mxu0 %v292_v7  ;;  %v329_v31 = vld [vmem:[#allocation7 + $0x10] sm:$0xff]  ;;  %v328_v32 = vld [vmem:[#allocation7 + $0x8] sm:$0xff]  ;;  %v327_v33 = vld [vmem:[#allocation7] sm:$0xff]  ;;  %p712_p1 = scmp.ne.s32.totalorder %s710_s16, %s711_s28  ;;  %p717_p2 = scmp.lt.s32.totalorder %s715_s24, %s711_s28 }
  0x3b   : > { %520 = vmatpush.msra.mxu3 %v338_v12  ;;  %351 = vmatpush.msra.mxu1 %v338_v12  ;;  %v603_v34 = vld [vmem:[%s969_s2] ss:$0 sm:$0xff] }
  0x3c   : > { %506 = vmatpush.msra.mxu2 %v291_v9  ;;  %308 = vmatpush.msra.mxu0 %v291_v9  ;;  %v604_v41 = vld [vmem:[%s971_s4] ss:$0 sm:$0xff]  ;;  %p713_p4 = pnand %p712_p1, %p875_p3  ;;  %p718_p9 = por %p717_p2, %p716_p11 }
  0x3d   : > { %521 = vmatpush.msra.mxu3 %v337_v14  ;;  %352 = vmatpush.msra.mxu1 %v337_v14 }
  0x3e   : > { %507 = vmatpush.msra.mxu2 %v290_v11  ;;  %309 = vmatpush.msra.mxu0 %v290_v11  ;;  %p714_p8 = pneg %p713_p4 }
  0x3f   : > { %522 = vmatpush.msra.mxu3 %v336_v16  ;;  %353 = vmatpush.msra.mxu1 %v336_v16 }
  0x40   : > { %508 = vmatpush.msra.mxu2 %v289_v13  ;;  %310 = vmatpush.msra.mxu0 %v289_v13  ;;  %p719_p10 = pnand %p718_p9, %p714_p8 }
  0x41   : > { %523 = vmatpush.msra.mxu3 %v335_v18  ;;  %354 = vmatpush.msra.mxu1 %v335_v18 }
  0x42   : > { %509 = vmatpush.msra.mxu2 %v288_v15  ;;  %311 = vmatpush.msra.mxu0 %v288_v15 }
  0x43   : > { %524 = vmatpush.msra.mxu3 %v334_v20  ;;  %355 = vmatpush.msra.mxu1 %v334_v20 }
  0x44   : > { %510 = vmatpush.msra.mxu2 %v287_v17  ;;  %312 = vmatpush.msra.mxu0 %v287_v17 }
  0x45   : > { %525 = vmatpush.msra.mxu3 %v333_v22  ;;  %356 = vmatpush.msra.mxu1 %v333_v22 }
  0x46   : > { %511 = vmatpush.msra.mxu2 %v286_v19  ;;  %313 = vmatpush.msra.mxu0 %v286_v19 }
  0x47   : > { %526 = vmatpush.msra.mxu3 %v332_v24  ;;  %357 = vmatpush.msra.mxu1 %v332_v24 }
  0x48   : > { %512 = vmatpush.msra.mxu2 %v285_v21  ;;  %314 = vmatpush.msra.mxu0 %v285_v21 }
  0x49   : > { %527 = vmatpush.msra.mxu3 %v331_v26  ;;  %358 = vmatpush.msra.mxu1 %v331_v26 }
  0x4a   : > { %513 = vmatpush.msra.mxu2 %v284_v23  ;;  %315 = vmatpush.msra.mxu0 %v284_v23 }
  0x4b   : > { %528 = vmatpush.msra.mxu3 %v330_v30  ;;  %359 = vmatpush.msra.mxu1 %v330_v30 }
  0x4c   : > { %514 = vmatpush.msra.mxu2 %v283_v25  ;;  %316 = vmatpush.msra.mxu0 %v283_v25 }
  0x4d   : > { %529 = vmatpush.msra.mxu3 %v329_v31  ;;  %360 = vmatpush.msra.mxu1 %v329_v31 }
  0x4e   : > { %515 = vmatpush.msra.mxu2 %v282_v27  ;;  %317 = vmatpush.msra.mxu0 %v282_v27 }
  0x4f   : > { %321 = vmatmul.f32.vlgmr.msra.gmra.mxu2 %v281_v28  ;;  %318 = vmatmul.f32.vlgmr.msra.gmra.mxu0 %v280_v29 }
  0x50   : > { %530 = vmatpush.msra.mxu3 %v328_v32  ;;  %361 = vmatpush.msra.mxu1 %v328_v32 }
  0x52   : > { %531 = vmatpush.msra.mxu3 %v327_v33  ;;  %362 = vmatpush.msra.mxu1 %v327_v33 }
  0xcc   : > { %v319_v35 = vpop.f32.mrf.mxu0 }
  0xcd   : > { %v320_v36 = vadd.f32 %v603_v34, %v319_v35 }
  0xcf   : > { %v325_v37 = vmax.f32 %v320_v36, 0.0 }
  0xd1   : > { %363 = vmatmul.f32.vlgmr.msra.gmra.mxu1 %v325_v37 }
  0xd2   : > { %v322_v38 = vpop.f32.mrf.mxu2 }
  0xd3   : > { %v323_v39 = vadd.f32 %v603_v34, %v322_v38 }
  0xd5   : > { %v326_v40 = vmax.f32 %v323_v39, 0.0 }
  0xd7   : > { %366 = vmatmul.f32.vlgmr.msra.gmra.mxu3 %v326_v40 }
 0x14e   : > { %v364_v42 = vpop.f32.mrf.mxu1 }
 0x14f   : > { %v365_v43 = vadd.f32 %v604_v41, %v364_v42 }
 0x151   : > { %370 = vst [vmem:[%s277_s12] sm:$0xff] %v365_v43 }
 0x15a   : > { %v367_v44 = vpop.f32.mrf.mxu3 }
 0x15b   : > { %v368_v45 = vadd.f32 %v604_v41, %v367_v44 }
 0x15d   : > { %371 = vst [vmem:[%s277_s12 + $0x8] sm:$0xff] %v368_v45 }
 0x15e   : > { %722 = shalt.err (!%p719_p10)
}
 0x15f   : > { %s771_s8 = smov 128   ;;  %s772_s9 = smov 8  }
 0x160   : > { %542 = dma.vmem_to_hbm [thread:$0]  (%p875_p3), %s386_s6, 256, %s388_s7, %s373_s26, %s771_s8, %s771_s8, %s772_s9  }
 0x161 PF: > { %s402_s12 = sand.u32 1, %s753_s18   ;;  %p980_p12 = scmp.ge.s32.totalorder %s765_s21, 2 }
 0x162   : > { %s403_s13 = scalar_lea.sflag [#allocation4], %s402_s12 }
 0x163   : > { %p556_p13 = pnand %p980_p12, %p838_p6 }
 0x165   : > { %p557_p0 = pneg %p556_p13 }
 0x167   : > { %748 = dma.done.wait (%p557_p0), %s403_s13, 256  }
 0x168   : > { %750 = vsyncadd (%p557_p0), %s403_s13, 4294967040  ;;  %p19_p5 = scmp.ge.s32.totalorder %s865_s14, 4   ;;  %s981_s18 = smov %s757_s19 }
 0x169   : > { %s982_s19 = smov %s761_s20  ;;  %s983_s20 = smov %s881_s23 }
 0x16a   : > { %s984_s21 = smov %s865_s14  ;;  %21 = sbr.rel (!%p19_p5) target bundleno = 6 (0x6), region = 93 }
 0x16f   :  { %409 = vsyncpa [#allocation3], 1 }
 0x170   :  { %411 = vsyncpa [#allocation3 + $0x1], 1 }
 0x171   :  { %412 = vsyncpa [#allocation6], 1 }
 0x172   :  { %413 = vsyncpa [#allocation4], 1 }
 0x173   :  { %415 = vsyncpa [#allocation4 + $0x1], 1 }

</bundles_post_ra>
